<compile_context>
chip_gen: v6e
topology: v6e:2x2x1
jax: 0.10.0
libtpu: 0.0.40
codegen_flags: <defaults>
</compile_context>

<pallas_src>
import jax
import jax.numpy as jnp
from jax import lax
from jax.experimental import pallas as pl
from jax.experimental.pallas import tpu as pltpu

P_DROP = 0.2
KEEP_SCALE = 1.0 / (1.0 - P_DROP)
DROP_THRESH = int(P_DROP * (1 << 23))      # keep iff 23 random bits >= thresh

NUM_CLASSES = 10
PAD_CLASSES = 128                          # lane-dense final layer / output
MAX_TB = 256                               # batch rows per grid step


def _s32(v):
    """Python int -> two's-complement int32 value."""
    v &= 0xFFFFFFFF
    return v - (1 << 32) if v >= (1 << 31) else v


_MUR1 = _s32(0x85EBCA6B)
_MUR2 = _s32(0xC2B2AE35)
_GOLD = _s32(0x9E3779B9)
_LAYER_SALT = tuple(_s32((i + 1) * 0x9E3779B9) for i in range(3))


def _fmix32(v):
    """murmur3 finalizer on int32 (wrapping mults, logical shifts)."""
    v = v ^ lax.shift_right_logical(v, jnp.int32(16))
    v = v * jnp.int32(_MUR1)
    v = v ^ lax.shift_right_logical(v, jnp.int32(13))
    v = v * jnp.int32(_MUR2)
    v = v ^ lax.shift_right_logical(v, jnp.int32(16))
    return v


def mlp_kernel(seed_ref,                    # SMEM (1,) int32 seed
               x_ref,                       # (TB, 784) bf16
               w1_ref, b1_ref,              # (784, 256) bf16, (1, 256) f32
               w2_ref, b2_ref,              # (256, 128) bf16, (1, 128) f32
               w3_ref, b3_ref,              # (128, 64)  bf16, (1, 64)  f32
               w4_ref, b4_ref,              # (64, 128)  bf16, (1, 128) f32 (padded)
               o_ref):                      # (TB, 128) f32
    tb = x_ref.shape[0]
    base_row = pl.program_id(0) * tb        # per-grid-step offset -> unique masks
    seed = seed_ref[0]

    def dropout(h, layer):
        # inverted dropout matching torch.dropout(p=0.2, train=True):
        # keep with prob 0.8, scale kept values by 1/0.8.
        rows = lax.broadcasted_iota(jnp.int32, h.shape, 0)
        cols = lax.broadcasted_iota(jnp.int32, h.shape, 1)
        idx = (base_row + rows) * jnp.int32(256) + cols        # unique per elem
        mix = seed * jnp.int32(_GOLD) + jnp.int32(_LAYER_SALT[layer])
        bits = lax.shift_right_logical(_fmix32(idx ^ mix), jnp.int32(9))
        keep = bits >= jnp.int32(DROP_THRESH)                  # int-domain cmp
        return jnp.where(keep, h * jnp.float32(KEEP_SCALE), jnp.float32(0.0))

    x = x_ref[...]                                             # bf16

    h = jnp.dot(x, w1_ref[...], preferred_element_type=jnp.float32) + b1_ref[...]
    h = dropout(jnp.maximum(h, 0.0), 0)

    h = jnp.dot(h.astype(jnp.bfloat16), w2_ref[...],
                preferred_element_type=jnp.float32) + b2_ref[...]
    h = dropout(jnp.maximum(h, 0.0), 1)

    h = jnp.dot(h.astype(jnp.bfloat16), w3_ref[...],
                preferred_element_type=jnp.float32) + b3_ref[...]
    h = dropout(jnp.maximum(h, 0.0), 2)

    logits = jnp.dot(h.astype(jnp.bfloat16), w4_ref[...],
                     preferred_element_type=jnp.float32) + b4_ref[...]

    # softmax over the 10 real classes; padded lanes masked to ~-inf -> exp==0
    cols = lax.broadcasted_iota(jnp.int32, logits.shape, 1)
    logits = jnp.where(cols < NUM_CLASSES, logits, jnp.float32(-1e30))
    m = jnp.max(logits, axis=1, keepdims=True)
    e = jnp.exp(logits - m)
    o_ref[...] = e / jnp.sum(e, axis=1, keepdims=True)


def _round_up(v, m):
    return (v + m - 1) // m * m


@jax.jit
def my_model_forward(x_nchw, params, seed):
    """x_nchw: (B, 1, 28, 28) float32. Returns (B, 10) softmax probabilities."""
    B = x_nchw.shape[0]
    x = x_nchw.reshape((B, 784)).astype(jnp.bfloat16)

    TB = min(MAX_TB, _round_up(B, 8))
    B_pad = _round_up(B, TB)
    if B_pad != B:
        x = jnp.pad(x, ((0, B_pad - B), (0, 0)))

    (w1, b1), (w2, b2), (w3, b3), (w4, b4) = params
    # bf16 MXU operands; biases stay f32 (added to the f32 accumulator).
    w1, w2, w3, w4 = [w.astype(jnp.bfloat16) for w in (w1, w2, w3, w4)]
    # lane-dense final layer: pad classes 10 -> 128 with zeros.
    w4 = jnp.pad(w4, ((0, 0), (0, PAD_CLASSES - NUM_CLASSES)))
    b4 = jnp.pad(b4, ((0, 0), (0, PAD_CLASSES - NUM_CLASSES)))

    const = lambda i: (0, 0)   # weights/biases: same block every step -> resident

    out = pl.pallas_call(
        mlp_kernel,
        out_shape=jax.ShapeDtypeStruct((B_pad, PAD_CLASSES), jnp.float32),
        grid=(B_pad // TB,),
        in_specs=[
            pl.BlockSpec(memory_space=pltpu.MemorySpace.SMEM),      # seed
            pl.BlockSpec((TB, 784), lambda i: (i, 0)),              # x
            pl.BlockSpec((784, 256), const), pl.BlockSpec((1, 256), const),
            pl.BlockSpec((256, 128), const), pl.BlockSpec((1, 128), const),
            pl.BlockSpec((128, 64), const),  pl.BlockSpec((1, 64), const),
            pl.BlockSpec((64, PAD_CLASSES), const),
            pl.BlockSpec((1, PAD_CLASSES), const),
        ],
        out_specs=pl.BlockSpec((TB, PAD_CLASSES), lambda i: (i, 0)),
        compiler_params=pltpu.CompilerParams(
            dimension_semantics=("parallel",)),
    )(seed, x, w1, b1, w2, b2, w3, b3, w4, b4)

    return out[:B, :NUM_CLASSES]


def init_params(key):
    """torch.nn.Linear-style init (U[-1/sqrt(in), 1/sqrt(in)]).

    Weights stored (in_features, out_features); biases (1, out_features)."""
    dims = [(784, 256), (256, 128), (128, 64), (64, 10)]
    params = []
    for fan_in, fan_out in dims:
        key, kw, kb = jax.random.split(key, 3)
        bound = 1.0 / jnp.sqrt(jnp.float32(fan_in))
        w = jax.random.uniform(kw, (fan_in, fan_out), jnp.float32, -bound, bound)
        b = jax.random.uniform(kb, (1, fan_out), jnp.float32, -bound, bound)
        params.append((w, b))
    return params


if __name__ == "__main__":
    key = jax.random.PRNGKey(0)
    k_params, k_x = jax.random.split(key)

    params = init_params(k_params)
    B = 8
    x = jax.random.normal(k_x, (B, 1, 28, 28), dtype=jnp.float32)
    seed = jnp.array([0], dtype=jnp.int32)

    out = jax.block_until_ready(my_model_forward(x, params, seed))

    assert out.shape == (B, 10)
    assert bool(jnp.all(jnp.isfinite(out)))
    assert bool(jnp.all(out >= 0.0))
    # softmax rows should sum to 1
    assert bool(jnp.allclose(jnp.sum(out, axis=1), 1.0, atol=1e-4))
    print("KERNEL_OK")
</pallas_src>

<mosaic_0001>
module attributes {stable_mosaic.version = 11 : i64} {
  func.func @mlp_kernel(%arg0: i32, %arg1: memref<1xi32, #tpu.memory_space<smem>>, %arg2: memref<8x784xbf16, #tpu.memory_space<vmem>>, %arg3: memref<784x256xbf16, #tpu.memory_space<vmem>>, %arg4: memref<1x256xf32, #tpu.memory_space<vmem>>, %arg5: memref<256x128xbf16, #tpu.memory_space<vmem>>, %arg6: memref<1x128xf32, #tpu.memory_space<vmem>>, %arg7: memref<128x64xbf16, #tpu.memory_space<vmem>>, %arg8: memref<1x64xf32, #tpu.memory_space<vmem>>, %arg9: memref<64x128xbf16, #tpu.memory_space<vmem>>, %arg10: memref<1x128xf32, #tpu.memory_space<vmem>>, %arg11: memref<8x128xf32, #tpu.memory_space<vmem>>) attributes {dimension_semantics = [#tpu.dimension_semantics<parallel>], iteration_bounds = array<i64: 1>, scalar_prefetch = 0 : i64, scratch_operands = 0 : i64, tpu.core_type = #tpu.core_type<tc>, window_params = [{transform_indices = @transform_0, window_bounds = array<i64: 1>}, {transform_indices = @transform_1, window_bounds = array<i64: 8, 784>}, {pipeline_mode = #tpu.pipeline_mode<synchronous>, transform_indices = @transform_2, window_bounds = array<i64: 784, 256>}, {pipeline_mode = #tpu.pipeline_mode<synchronous>, transform_indices = @transform_3, window_bounds = array<i64: 1, 256>}, {pipeline_mode = #tpu.pipeline_mode<synchronous>, transform_indices = @transform_4, window_bounds = array<i64: 256, 128>}, {pipeline_mode = #tpu.pipeline_mode<synchronous>, transform_indices = @transform_5, window_bounds = array<i64: 1, 128>}, {pipeline_mode = #tpu.pipeline_mode<synchronous>, transform_indices = @transform_6, window_bounds = array<i64: 128, 64>}, {pipeline_mode = #tpu.pipeline_mode<synchronous>, transform_indices = @transform_7, window_bounds = array<i64: 1, 64>}, {pipeline_mode = #tpu.pipeline_mode<synchronous>, transform_indices = @transform_8, window_bounds = array<i64: 64, 128>}, {pipeline_mode = #tpu.pipeline_mode<synchronous>, transform_indices = @transform_9, window_bounds = array<i64: 1, 128>}, {transform_indices = @transform_10, window_bounds = array<i64: 8, 128>}]} {
    %c8_i32 = arith.constant 8 : i32
    %0 = arith.muli %arg0, %c8_i32 : i32
    %c0 = arith.constant 0 : index
    %1 = memref.load %arg1[%c0] : memref<1xi32, #tpu.memory_space<smem>>
    %c0_0 = arith.constant 0 : index
    %c0_1 = arith.constant 0 : index
    %2 = vector.load %arg2[%c0_0, %c0_1] : memref<8x784xbf16, #tpu.memory_space<vmem>>, vector<8x784xbf16>
    %c0_2 = arith.constant 0 : index
    %c0_3 = arith.constant 0 : index
    %3 = vector.load %arg3[%c0_2, %c0_3] : memref<784x256xbf16, #tpu.memory_space<vmem>>, vector<784x256xbf16>
    %cst = arith.constant dense<0.000000e+00> : vector<8x256xf32>
    %4 = tpu.matmul %2, %3, %cst {dimension_numbers = #tpu.dot_dimension_numbers<[1], [0], [0], [1], [0, 0, 1, 1], [], []>} : vector<8x784xbf16>, vector<784x256xbf16>, vector<8x256xf32> -> vector<8x256xf32>
    %c0_4 = arith.constant 0 : index
    %c0_5 = arith.constant 0 : index
    %5 = vector.load %arg4[%c0_4, %c0_5] : memref<1x256xf32, #tpu.memory_space<vmem>>, vector<1x256xf32>
    %6 = vector.broadcast %5 : vector<1x256xf32> to vector<8x256xf32>
    %7 = arith.addf %4, %6 : vector<8x256xf32>
    %cst_6 = arith.constant 0.000000e+00 : f32
    %8 = vector.broadcast %cst_6 : f32 to vector<8x256xf32>
    %9 = arith.maximumf %7, %8 : vector<8x256xf32>
    %10 = tpu.iota {dimensions = array<i32: 0>} : vector<8x256xi32>
    %11 = tpu.iota {dimensions = array<i32: 1>} : vector<8x256xi32>
    %12 = vector.broadcast %0 : i32 to vector<8x256xi32>
    %13 = arith.addi %12, %10 : vector<8x256xi32>
    %c256_i32 = arith.constant 256 : i32
    %14 = vector.broadcast %c256_i32 : i32 to vector<8x256xi32>
    %15 = arith.muli %13, %14 : vector<8x256xi32>
    %16 = arith.addi %15, %11 : vector<8x256xi32>
    %c-1640531527_i32 = arith.constant -1640531527 : i32
    %17 = arith.muli %1, %c-1640531527_i32 : i32
    %c-1640531527_i32_7 = arith.constant -1640531527 : i32
    %18 = arith.addi %17, %c-1640531527_i32_7 : i32
    %19 = vector.broadcast %18 : i32 to vector<8x256xi32>
    %20 = arith.xori %16, %19 : vector<8x256xi32>
    %c16_i32 = arith.constant 16 : i32
    %21 = vector.broadcast %c16_i32 : i32 to vector<8x256xi32>
    %22 = arith.shrui %20, %21 : vector<8x256xi32>
    %23 = arith.xori %20, %22 : vector<8x256xi32>
    %c-2048144789_i32 = arith.constant -2048144789 : i32
    %24 = vector.broadcast %c-2048144789_i32 : i32 to vector<8x256xi32>
    %25 = arith.muli %23, %24 : vector<8x256xi32>
    %c13_i32 = arith.constant 13 : i32
    %26 = vector.broadcast %c13_i32 : i32 to vector<8x256xi32>
    %27 = arith.shrui %25, %26 : vector<8x256xi32>
    %28 = arith.xori %25, %27 : vector<8x256xi32>
    %c-1028477387_i32 = arith.constant -1028477387 : i32
    %29 = vector.broadcast %c-1028477387_i32 : i32 to vector<8x256xi32>
    %30 = arith.muli %28, %29 : vector<8x256xi32>
    %c16_i32_8 = arith.constant 16 : i32
    %31 = vector.broadcast %c16_i32_8 : i32 to vector<8x256xi32>
    %32 = arith.shrui %30, %31 : vector<8x256xi32>
    %33 = arith.xori %30, %32 : vector<8x256xi32>
    %c9_i32 = arith.constant 9 : i32
    %34 = vector.broadcast %c9_i32 : i32 to vector<8x256xi32>
    %35 = arith.shrui %33, %34 : vector<8x256xi32>
    %c1677721_i32 = arith.constant 1677721 : i32
    %36 = vector.broadcast %c1677721_i32 : i32 to vector<8x256xi32>
    %37 = arith.cmpi sge, %35, %36 : vector<8x256xi32>
    %cst_9 = arith.constant 1.250000e+00 : f32
    %38 = vector.broadcast %cst_9 : f32 to vector<8x256xf32>
    %39 = arith.mulf %9, %38 : vector<8x256xf32>
    %cst_10 = arith.constant 0.000000e+00 : f32
    %40 = vector.broadcast %cst_10 : f32 to vector<8x256xf32>
    %41 = arith.select %37, %39, %40 : vector<8x256xi1>, vector<8x256xf32>
    %42 = arith.truncf %41 : vector<8x256xf32> to vector<8x256xbf16>
    %c0_11 = arith.constant 0 : index
    %c0_12 = arith.constant 0 : index
    %43 = vector.load %arg5[%c0_11, %c0_12] : memref<256x128xbf16, #tpu.memory_space<vmem>>, vector<256x128xbf16>
    %cst_13 = arith.constant dense<0.000000e+00> : vector<8x128xf32>
    %44 = tpu.matmul %42, %43, %cst_13 {dimension_numbers = #tpu.dot_dimension_numbers<[1], [0], [0], [1], [0, 0, 1, 1], [], []>} : vector<8x256xbf16>, vector<256x128xbf16>, vector<8x128xf32> -> vector<8x128xf32>
    %c0_14 = arith.constant 0 : index
    %c0_15 = arith.constant 0 : index
    %45 = vector.load %arg6[%c0_14, %c0_15] : memref<1x128xf32, #tpu.memory_space<vmem>>, vector<1x128xf32>
    %46 = vector.broadcast %45 : vector<1x128xf32> to vector<8x128xf32>
    %47 = arith.addf %44, %46 : vector<8x128xf32>
    %cst_16 = arith.constant 0.000000e+00 : f32
    %48 = vector.broadcast %cst_16 : f32 to vector<8x128xf32>
    %49 = arith.maximumf %47, %48 : vector<8x128xf32>
    %50 = tpu.iota {dimensions = array<i32: 0>} : vector<8x128xi32>
    %51 = tpu.iota {dimensions = array<i32: 1>} : vector<8x128xi32>
    %52 = vector.broadcast %0 : i32 to vector<8x128xi32>
    %53 = arith.addi %52, %50 : vector<8x128xi32>
    %c256_i32_17 = arith.constant 256 : i32
    %54 = vector.broadcast %c256_i32_17 : i32 to vector<8x128xi32>
    %55 = arith.muli %53, %54 : vector<8x128xi32>
    %56 = arith.addi %55, %51 : vector<8x128xi32>
    %c-1640531527_i32_18 = arith.constant -1640531527 : i32
    %57 = arith.muli %1, %c-1640531527_i32_18 : i32
    %c1013904242_i32 = arith.constant 1013904242 : i32
    %58 = arith.addi %57, %c1013904242_i32 : i32
    %59 = vector.broadcast %58 : i32 to vector<8x128xi32>
    %60 = arith.xori %56, %59 : vector<8x128xi32>
    %c16_i32_19 = arith.constant 16 : i32
    %61 = vector.broadcast %c16_i32_19 : i32 to vector<8x128xi32>
    %62 = arith.shrui %60, %61 : vector<8x128xi32>
    %63 = arith.xori %60, %62 : vector<8x128xi32>
    %c-2048144789_i32_20 = arith.constant -2048144789 : i32
    %64 = vector.broadcast %c-2048144789_i32_20 : i32 to vector<8x128xi32>
    %65 = arith.muli %63, %64 : vector<8x128xi32>
    %c13_i32_21 = arith.constant 13 : i32
    %66 = vector.broadcast %c13_i32_21 : i32 to vector<8x128xi32>
    %67 = arith.shrui %65, %66 : vector<8x128xi32>
    %68 = arith.xori %65, %67 : vector<8x128xi32>
    %c-1028477387_i32_22 = arith.constant -1028477387 : i32
    %69 = vector.broadcast %c-1028477387_i32_22 : i32 to vector<8x128xi32>
    %70 = arith.muli %68, %69 : vector<8x128xi32>
    %c16_i32_23 = arith.constant 16 : i32
    %71 = vector.broadcast %c16_i32_23 : i32 to vector<8x128xi32>
    %72 = arith.shrui %70, %71 : vector<8x128xi32>
    %73 = arith.xori %70, %72 : vector<8x128xi32>
    %c9_i32_24 = arith.constant 9 : i32
    %74 = vector.broadcast %c9_i32_24 : i32 to vector<8x128xi32>
    %75 = arith.shrui %73, %74 : vector<8x128xi32>
    %c1677721_i32_25 = arith.constant 1677721 : i32
    %76 = vector.broadcast %c1677721_i32_25 : i32 to vector<8x128xi32>
    %77 = arith.cmpi sge, %75, %76 : vector<8x128xi32>
    %cst_26 = arith.constant 1.250000e+00 : f32
    %78 = vector.broadcast %cst_26 : f32 to vector<8x128xf32>
    %79 = arith.mulf %49, %78 : vector<8x128xf32>
    %cst_27 = arith.constant 0.000000e+00 : f32
    %80 = vector.broadcast %cst_27 : f32 to vector<8x128xf32>
    %81 = arith.select %77, %79, %80 : vector<8x128xi1>, vector<8x128xf32>
    %82 = arith.truncf %81 : vector<8x128xf32> to vector<8x128xbf16>
    %c0_28 = arith.constant 0 : index
    %c0_29 = arith.constant 0 : index
    %83 = vector.load %arg7[%c0_28, %c0_29] : memref<128x64xbf16, #tpu.memory_space<vmem>>, vector<128x64xbf16>
    %cst_30 = arith.constant dense<0.000000e+00> : vector<8x64xf32>
    %84 = tpu.matmul %82, %83, %cst_30 {dimension_numbers = #tpu.dot_dimension_numbers<[1], [0], [0], [1], [0, 0, 1, 1], [], []>} : vector<8x128xbf16>, vector<128x64xbf16>, vector<8x64xf32> -> vector<8x64xf32>
    %c0_31 = arith.constant 0 : index
    %c0_32 = arith.constant 0 : index
    %85 = vector.load %arg8[%c0_31, %c0_32] : memref<1x64xf32, #tpu.memory_space<vmem>>, vector<1x64xf32>
    %86 = vector.broadcast %85 : vector<1x64xf32> to vector<8x64xf32>
    %87 = arith.addf %84, %86 : vector<8x64xf32>
    %cst_33 = arith.constant 0.000000e+00 : f32
    %88 = vector.broadcast %cst_33 : f32 to vector<8x64xf32>
    %89 = arith.maximumf %87, %88 : vector<8x64xf32>
    %90 = tpu.iota {dimensions = array<i32: 0>} : vector<8x64xi32>
    %91 = tpu.iota {dimensions = array<i32: 1>} : vector<8x64xi32>
    %92 = vector.broadcast %0 : i32 to vector<8x64xi32>
    %93 = arith.addi %92, %90 : vector<8x64xi32>
    %c256_i32_34 = arith.constant 256 : i32
    %94 = vector.broadcast %c256_i32_34 : i32 to vector<8x64xi32>
    %95 = arith.muli %93, %94 : vector<8x64xi32>
    %96 = arith.addi %95, %91 : vector<8x64xi32>
    %c-1640531527_i32_35 = arith.constant -1640531527 : i32
    %97 = arith.muli %1, %c-1640531527_i32_35 : i32
    %c-626627285_i32 = arith.constant -626627285 : i32
    %98 = arith.addi %97, %c-626627285_i32 : i32
    %99 = vector.broadcast %98 : i32 to vector<8x64xi32>
    %100 = arith.xori %96, %99 : vector<8x64xi32>
    %c16_i32_36 = arith.constant 16 : i32
    %101 = vector.broadcast %c16_i32_36 : i32 to vector<8x64xi32>
    %102 = arith.shrui %100, %101 : vector<8x64xi32>
    %103 = arith.xori %100, %102 : vector<8x64xi32>
    %c-2048144789_i32_37 = arith.constant -2048144789 : i32
    %104 = vector.broadcast %c-2048144789_i32_37 : i32 to vector<8x64xi32>
    %105 = arith.muli %103, %104 : vector<8x64xi32>
    %c13_i32_38 = arith.constant 13 : i32
    %106 = vector.broadcast %c13_i32_38 : i32 to vector<8x64xi32>
    %107 = arith.shrui %105, %106 : vector<8x64xi32>
    %108 = arith.xori %105, %107 : vector<8x64xi32>
    %c-1028477387_i32_39 = arith.constant -1028477387 : i32
    %109 = vector.broadcast %c-1028477387_i32_39 : i32 to vector<8x64xi32>
    %110 = arith.muli %108, %109 : vector<8x64xi32>
    %c16_i32_40 = arith.constant 16 : i32
    %111 = vector.broadcast %c16_i32_40 : i32 to vector<8x64xi32>
    %112 = arith.shrui %110, %111 : vector<8x64xi32>
    %113 = arith.xori %110, %112 : vector<8x64xi32>
    %c9_i32_41 = arith.constant 9 : i32
    %114 = vector.broadcast %c9_i32_41 : i32 to vector<8x64xi32>
    %115 = arith.shrui %113, %114 : vector<8x64xi32>
    %c1677721_i32_42 = arith.constant 1677721 : i32
    %116 = vector.broadcast %c1677721_i32_42 : i32 to vector<8x64xi32>
    %117 = arith.cmpi sge, %115, %116 : vector<8x64xi32>
    %cst_43 = arith.constant 1.250000e+00 : f32
    %118 = vector.broadcast %cst_43 : f32 to vector<8x64xf32>
    %119 = arith.mulf %89, %118 : vector<8x64xf32>
    %cst_44 = arith.constant 0.000000e+00 : f32
    %120 = vector.broadcast %cst_44 : f32 to vector<8x64xf32>
    %121 = arith.select %117, %119, %120 : vector<8x64xi1>, vector<8x64xf32>
    %122 = arith.truncf %121 : vector<8x64xf32> to vector<8x64xbf16>
    %c0_45 = arith.constant 0 : index
    %c0_46 = arith.constant 0 : index
    %123 = vector.load %arg9[%c0_45, %c0_46] : memref<64x128xbf16, #tpu.memory_space<vmem>>, vector<64x128xbf16>
    %cst_47 = arith.constant dense<0.000000e+00> : vector<8x128xf32>
    %124 = tpu.matmul %122, %123, %cst_47 {dimension_numbers = #tpu.dot_dimension_numbers<[1], [0], [0], [1], [0, 0, 1, 1], [], []>} : vector<8x64xbf16>, vector<64x128xbf16>, vector<8x128xf32> -> vector<8x128xf32>
    %c0_48 = arith.constant 0 : index
    %c0_49 = arith.constant 0 : index
    %125 = vector.load %arg10[%c0_48, %c0_49] : memref<1x128xf32, #tpu.memory_space<vmem>>, vector<1x128xf32>
    %126 = vector.broadcast %125 : vector<1x128xf32> to vector<8x128xf32>
    %127 = arith.addf %124, %126 : vector<8x128xf32>
    %128 = tpu.iota {dimensions = array<i32: 1>} : vector<8x128xi32>
    %c10_i32 = arith.constant 10 : i32
    %129 = vector.broadcast %c10_i32 : i32 to vector<8x128xi32>
    %130 = arith.cmpi slt, %128, %129 : vector<8x128xi32>
    %cst_50 = arith.constant -1.000000e+30 : f32
    %131 = vector.broadcast %cst_50 : f32 to vector<8x128xf32>
    %132 = arith.select %130, %127, %131 : vector<8x128xi1>, vector<8x128xf32>
    %cst_51 = arith.constant dense<0xFF800000> : vector<8xf32>
    %133 = vector.multi_reduction <maximumf>, %132, %cst_51 [1] : vector<8x128xf32> to vector<8xf32>
    %134 = vector.shape_cast %133 : vector<8xf32> to vector<8x1xf32>
    %135 = vector.broadcast %134 : vector<8x1xf32> to vector<8x128xf32>
    %136 = arith.subf %132, %135 : vector<8x128xf32>
    %137 = math.exp %136 : vector<8x128xf32>
    %cst_52 = arith.constant dense<0.000000e+00> : vector<8xf32>
    %138 = vector.multi_reduction <add>, %137, %cst_52 [1] : vector<8x128xf32> to vector<8xf32>
    %139 = vector.shape_cast %138 : vector<8xf32> to vector<8x1xf32>
    %140 = vector.broadcast %139 : vector<8x1xf32> to vector<8x128xf32>
    %141 = arith.divf %137, %140 : vector<8x128xf32>
    %c0_53 = arith.constant 0 : index
    %c0_54 = arith.constant 0 : index
    %142 = vector.load %arg11[%c0_53, %c0_54] : memref<8x128xf32, #tpu.memory_space<vmem>>, vector<8x128xf32>
    tpu.vector_store %arg11[%c0_53, %c0_54], %141 {strides = array<i32>} : memref<8x128xf32, #tpu.memory_space<vmem>>, vector<8x128xf32>,
    return
  }
  func.func @transform_0(%arg0: i32) -> i32 {
    %c0_i32 = arith.constant 0 : i32
    %c0_i32_0 = arith.constant 0 : i32
    return %c0_i32 : i32
  }
  func.func @transform_1(%arg0: i32) -> (i32, i32) {
    %c0_i32 = arith.constant 0 : i32
    %c0_i32_0 = arith.constant 0 : i32
    return %arg0, %c0_i32 : i32, i32
  }
  func.func @transform_2(%arg0: i32) -> (i32, i32) {
    %c0_i32 = arith.constant 0 : i32
    %c0_i32_0 = arith.constant 0 : i32
    %c0_i32_1 = arith.constant 0 : i32
    return %c0_i32, %c0_i32_0 : i32, i32
  }
  func.func @transform_3(%arg0: i32) -> (i32, i32) {
    %c0_i32 = arith.constant 0 : i32
    %c0_i32_0 = arith.constant 0 : i32
    %c0_i32_1 = arith.constant 0 : i32
    return %c0_i32, %c0_i32_0 : i32, i32
  }
  func.func @transform_4(%arg0: i32) -> (i32, i32) {
    %c0_i32 = arith.constant 0 : i32
    %c0_i32_0 = arith.constant 0 : i32
    %c0_i32_1 = arith.constant 0 : i32
    return %c0_i32, %c0_i32_0 : i32, i32
  }
  func.func @transform_5(%arg0: i32) -> (i32, i32) {
    %c0_i32 = arith.constant 0 : i32
    %c0_i32_0 = arith.constant 0 : i32
    %c0_i32_1 = arith.constant 0 : i32
    return %c0_i32, %c0_i32_0 : i32, i32
  }
  func.func @transform_6(%arg0: i32) -> (i32, i32) {
    %c0_i32 = arith.constant 0 : i32
    %c0_i32_0 = arith.constant 0 : i32
    %c0_i32_1 = arith.constant 0 : i32
    return %c0_i32, %c0_i32_0 : i32, i32
  }
  func.func @transform_7(%arg0: i32) -> (i32, i32) {
    %c0_i32 = arith.constant 0 : i32
    %c0_i32_0 = arith.constant 0 : i32
    %c0_i32_1 = arith.constant 0 : i32
    return %c0_i32, %c0_i32_0 : i32, i32
  }
  func.func @transform_8(%arg0: i32) -> (i32, i32) {
    %c0_i32 = arith.constant 0 : i32
    %c0_i32_0 = arith.constant 0 : i32
    %c0_i32_1 = arith.constant 0 : i32
    return %c0_i32, %c0_i32_0 : i32, i32
  }
  func.func @transform_9(%arg0: i32) -> (i32, i32) {
    %c0_i32 = arith.constant 0 : i32
    %c0_i32_0 = arith.constant 0 : i32
    %c0_i32_1 = arith.constant 0 : i32
    return %c0_i32, %c0_i32_0 : i32, i32
  }
  func.func @transform_10(%arg0: i32) -> (i32, i32) {
    %c0_i32 = arith.constant 0 : i32
    %c0_i32_0 = arith.constant 0 : i32
    return %arg0, %c0_i32 : i32, i32
  }
}

</mosaic_0001>

<bundles_post_ra>
// kernel: my_model_forward.1
= control target key start
LH: loop header
LB: loop body
LE: loop exit
PB: predicated region body
PF: predicated region fallthrough
CT: control target
= control target key end

     0   :  { %vm668_vm0 = vcmask 130048   ;;  %s2238_s0 = inlined_call_operand.<no memory space> [shape: s32[1], index: 0, kind: input, shape index: {}]   ;;  %s2239_s1 = inlined_call_operand.vmem [shape: bf16[8,784], index: 1, kind: input, shape index: {}]   ;;  %s2240_s2 = inlined_call_operand.vmem [shape: bf16[784,256], index: 2, kind: input, shape index: {}]   ;;  %s2241_s3 = inlined_call_operand.vmem [shape: f32[1,256], index: 3, kind: input, shape index: {}]   ;;  %s2242_s4 = inlined_call_operand.vmem [shape: bf16[256,128], index: 4, kind: input, shape index: {}]   ;;  %s2243_s5 = inlined_call_operand.vmem [shape: f32[1,128], index: 5, kind: input, shape index: {}]   ;;  %s2244_s6 = inlined_call_operand.vmem [shape: bf16[128,64], index: 6, kind: input, shape index: {}]   ;;  %s2245_s7 = inlined_call_operand.vmem [shape: f32[1,64], index: 7, kind: input, shape index: {}]   ;;  %s2246_s8 = inlined_call_operand.vmem [shape: bf16[64,128], index: 8, kind: input, shape index: {}]   ;;  %s2247_s9 = inlined_call_operand.vmem [shape: f32[1,128], index: 9, kind: input, shape index: {}]   ;;  %s2248_s10 = inlined_call_operand.hbm [shape: f32[8,128], index: 10, kind: output, shape index: {}]  }
   0x1   :  { %v1527_v0 = vld [vmem:[%s2240_s2 + $0x74] ss:$8 sps:$4 sm:$0xff]   ;;  %v1529_v1 = vld [vmem:[%s2240_s2 + $0x70] ss:$8 sps:$4 sm:$0xff]   ;;  %v1533_v4 = vld [vmem:[%s2240_s2 + $0x64] ss:$8 sps:$4 sm:$0xff]  }
   0x2   :  { %672 = vmatprep.subr.bf16.mxu0 %v1527_v0  ;;  %v1530_v2 = vld [vmem:[%s2240_s2 + $0x174] ss:$8 sps:$4 sm:$0xff]   ;;  %v1532_v3 = vld [vmem:[%s2240_s2 + $0x170] ss:$8 sps:$4 sm:$0xff]   ;;  %v1535_v5 = vld [vmem:[%s2240_s2 + $0x60] ss:$8 sps:$4 sm:$0xff]  }
   0x3   :  { %673 = vmatpush1.bf16.msra.mxu0 %v1529_v1  ;;  %713 = vmatprep.subr.bf16.mxu1 %v1530_v2  ;;  %v1536_v6 = vld [vmem:[%s2240_s2 + $0x164] ss:$8 sps:$4 sm:$0xff]   ;;  %v1538_v7 = vld [vmem:[%s2240_s2 + $0x160] ss:$8 sps:$4 sm:$0xff]   ;;  %v1539_v8 = vld [vmem:[%s2240_s2 + $0x54] ss:$8 sps:$4 sm:$0xff]  }
   0x4   :  { %714 = vmatpush1.bf16.msra.mxu1 %v1532_v3  ;;  %674 = vmatprep.subr.bf16.mxu0 %v1533_v4  ;;  %v1541_v9 = vld [vmem:[%s2240_s2 + $0x50] ss:$8 sps:$4 sm:$0xff]   ;;  %v1542_v10 = vld [vmem:[%s2240_s2 + $0x154] ss:$8 sps:$4 sm:$0xff]   ;;  %v1545_v11 = vld [vmem:[%s2240_s2 + $0x44] ss:$8 sps:$4 sm:$0xff]  }
   0x5   :  { %715 = vmatprep.subr.bf16.mxu1 %v1536_v6  ;;  %v1544_v12 = vld [vmem:[%s2240_s2 + $0x150] ss:$8 sps:$4 sm:$0xff]   ;;  %v1548_v13 = vld [vmem:[%s2240_s2 + $0x144] ss:$8 sps:$4 sm:$0xff]   ;;  %v1547_v14 = vld [vmem:[%s2240_s2 + $0x40] ss:$8 sps:$4 sm:$0xff]  }
   0x6   :  { %v1551_v15 = vld [vmem:[%s2240_s2 + $0x34] ss:$8 sps:$4 sm:$0xff]   ;;  %v1550_v16 = vld [vmem:[%s2240_s2 + $0x140] ss:$8 sps:$4 sm:$0xff]   ;;  %v1553_v18 = vld [vmem:[%s2240_s2 + $0x30] ss:$8 sps:$4 sm:$0xff]  }
   0x7   :  { %675 = vmatpush1.bf16.msra.mxu0 %v1535_v5  ;;  %v1554_v17 = vld [vmem:[%s2240_s2 + $0x134] ss:$8 sps:$4 sm:$0xff]   ;;  %v1557_v19 = vld [vmem:[%s2240_s2 + $0x24] ss:$8 sps:$4 sm:$0xff]   ;;  %v1556_v20 = vld [vmem:[%s2240_s2 + $0x130] ss:$8 sps:$4 sm:$0xff]  }
   0x8   :  { %676 = vmatprep.subr.bf16.mxu0 %v1539_v8  ;;  %716 = vmatpush1.bf16.msra.mxu1 %v1538_v7  ;;  %v1560_v21 = vld [vmem:[%s2240_s2 + $0x124] ss:$8 sps:$4 sm:$0xff]   ;;  %v1559_v22 = vld [vmem:[%s2240_s2 + $0x20] ss:$8 sps:$4 sm:$0xff]   ;;  %v1563_v23 = vld [vmem:[%s2240_s2 + $0x14] ss:$8 sps:$4 sm:$0xff]  }
   0x9   :  { %717 = vmatprep.subr.bf16.mxu1 %v1542_v10  ;;  %v1562_v24 = vld [vmem:[%s2240_s2 + $0x120] ss:$8 sps:$4 sm:$0xff]   ;;  %v1566_v25 = vld [vmem:[%s2240_s2 + $0x114] ss:$8 sps:$4 sm:$0xff]   ;;  %v1565_v26 = vld [vmem:[%s2240_s2 + $0x10] ss:$8 sps:$4 sm:$0xff]  }
   0xa   :  { %v1569_v27 = vld [vmem:[%s2240_s2 + $0x4] ss:$8 sps:$4 sm:$0xff]   ;;  %v1568_v28 = vld [vmem:[%s2240_s2 + $0x110] ss:$8 sps:$4 sm:$0xff]   ;;  %v1571_v30 = vld [vmem:[%s2240_s2] ss:$8 sps:$4 sm:$0xff]  }
   0xb   :  { %677 = vmatpush1.bf16.msra.mxu0 %v1541_v9  ;;  %v1572_v29 = vld [vmem:[%s2240_s2 + $0x104] ss:$8 sps:$4 sm:$0xff]   ;;  %v1575_v31 = vld [vmem:[%s2240_s2 + $0xf4] ss:$8 sps:$4 sm:$0xff]   ;;  %v1574_v32 = vld [vmem:[%s2240_s2 + $0x100] ss:$8 sps:$4 sm:$0xff]  }
   0xc   :  { %678 = vmatprep.subr.bf16.mxu0 %v1545_v11  ;;  %718 = vmatpush1.bf16.msra.mxu1 %v1544_v12  ;;  %v1578_v33 = vld [vmem:[%s2240_s2 + $0x1f4] ss:$8 sps:$4 sm:$0xff]   ;;  %v1577_v34 = vld [vmem:[%s2240_s2 + $0xf0] ss:$8 sps:$4 sm:$0xff]   ;;  %v1581_v35 = vld [vmem:[%s2240_s2 + $0xe4] ss:$8 sps:$4 sm:$0xff]  }
   0xd   :  { %719 = vmatprep.subr.bf16.mxu1 %v1548_v13  ;;  %v1580_v36 = vld [vmem:[%s2240_s2 + $0x1f0] ss:$8 sps:$4 sm:$0xff]   ;;  %v1584_v37 = vld [vmem:[%s2240_s2 + $0x1e4] ss:$8 sps:$4 sm:$0xff]   ;;  %v1583_v38 = vld [vmem:[%s2240_s2 + $0xe0] ss:$8 sps:$4 sm:$0xff]  }
   0xe   :  { %v1587_v39 = vld [vmem:[%s2240_s2 + $0xd4] ss:$8 sps:$4 sm:$0xff]   ;;  %v1586_v40 = vld [vmem:[%s2240_s2 + $0x1e0] ss:$8 sps:$4 sm:$0xff]   ;;  %v1589_v42 = vld [vmem:[%s2240_s2 + $0xd0] ss:$8 sps:$4 sm:$0xff]  }
   0xf   :  { %679 = vmatpush1.bf16.msra.mxu0 %v1547_v14  ;;  %v1590_v41 = vld [vmem:[%s2240_s2 + $0x1d4] ss:$8 sps:$4 sm:$0xff]   ;;  %v1593_v43 = vld [vmem:[%s2240_s2 + $0xc4] ss:$8 sps:$4 sm:$0xff]   ;;  %v1592_v44 = vld [vmem:[%s2240_s2 + $0x1d0] ss:$8 sps:$4 sm:$0xff]  }
  0x10   :  { %680 = vmatprep.subr.bf16.mxu0 %v1551_v15  ;;  %720 = vmatpush1.bf16.msra.mxu1 %v1550_v16  ;;  %v1596_v45 = vld [vmem:[%s2240_s2 + $0x1c4] ss:$8 sps:$4 sm:$0xff]   ;;  %v1595_v47 = vld [vmem:[%s2240_s2 + $0xc0] ss:$8 sps:$4 sm:$0xff]   ;;  %v1599_v49 = vld [vmem:[%s2240_s2 + $0xb4] ss:$8 sps:$4 sm:$0xff]  }
  0x11   :  { %721 = vmatprep.subr.bf16.mxu1 %v1554_v17  ;;  %v40_v46 = vld [vmem:[%s2239_s1] sm:$0xff]  ;;  %v41_v50 = vld [vmem:[%s2239_s1 + $0x8] sm:$0xff]  ;;  %v1602_v53 = vld [vmem:[%s2240_s2 + $0x1b4] ss:$8 sps:$4 sm:$0xff]   ;;  %v1735_v16 = vmov 0  }
  0x12   :  { %v1309_v48 = vcombine.high %v40_v46, %v40_v46  ;;  %v1598_v51 = vld [vmem:[%s2240_s2 + $0x1c0] ss:$8 sps:$4 sm:$0xff]   ;;  %v1311_v52 = vcombine.high %v41_v50, %v41_v50  ;;  %v1601_v54 = vld [vmem:[%s2240_s2 + $0xb0] ss:$8 sps:$4 sm:$0xff]   ;;  %v1605_v55 = vld [vmem:[%s2240_s2 + $0xa4] ss:$8 sps:$4 sm:$0xff]   ;;  %v1308_v5 = vcombine.low %v40_v46, %v40_v46  ;;  %v1310_v7 = vcombine.low %v41_v50, %v41_v50 }
  0x13   :  { %681 = vmatpush1.bf16.msra.mxu0 %v1553_v18  ;;  %v1604_v56 = vld [vmem:[%s2240_s2 + $0x1b0] ss:$8 sps:$4 sm:$0xff]   ;;  %v1608_v57 = vld [vmem:[%s2240_s2 + $0x1a4] ss:$8 sps:$4 sm:$0xff]   ;;  %v1607_v58 = vld [vmem:[%s2240_s2 + $0xa0] ss:$8 sps:$4 sm:$0xff]  }
  0x14   :  { %682 = vmatprep.subr.bf16.mxu0 %v1557_v19  ;;  %722 = vmatpush1.bf16.msra.mxu1 %v1556_v20  ;;  %v1611_v59 = vld [vmem:[%s2240_s2 + $0x94] ss:$8 sps:$4 sm:$0xff]   ;;  %v1610_v60 = vld [vmem:[%s2240_s2 + $0x1a0] ss:$8 sps:$4 sm:$0xff]   ;;  %v1613_v62 = vld [vmem:[%s2240_s2 + $0x90] ss:$8 sps:$4 sm:$0xff]  }
  0x15   :  { %723 = vmatprep.subr.bf16.mxu1 %v1560_v21  ;;  %704 = vmatprep.mubr.bf16.mxu0 %v1309_v48  ;;  %v1614_v61 = vld [vmem:[%s2240_s2 + $0x194] ss:$8 sps:$4 sm:$0xff]   ;;  %v1617_v63 = vld [vmem:[%s2240_s2 + $0x84] ss:$8 sps:$4 sm:$0xff]   ;;  %v1616_v0 = vld [vmem:[%s2240_s2 + $0x190] ss:$8 sps:$4 sm:$0xff]  }
  0x16   :  { %745 = vmatprep.mubr.bf16.mxu1 %v1311_v52  ;;  %v1620_v1 = vld [vmem:[%s2240_s2 + $0x184] ss:$8 sps:$4 sm:$0xff]   ;;  %v1619_v2 = vld [vmem:[%s2240_s2 + $0x80] ss:$8 sps:$4 sm:$0xff]   ;;  %v1627_v3 = vld [vmem:[%s2240_s2 + $0x274] ss:$8 sps:$4 sm:$0xff]  }
  0x17   :  { %683 = vmatpush1.bf16.msra.mxu0 %v1559_v22  ;;  %v1624_v4 = vld [vmem:[%s2240_s2 + $0x180] ss:$8 sps:$4 sm:$0xff]   ;;  %v1625_v6 = vld [vmem:[%s2240_s2 + $0x270] ss:$8 sps:$4 sm:$0xff]   ;;  %v1632_v8 = vld [vmem:[%s2240_s2 + $0x264] ss:$8 sps:$4 sm:$0xff]  }
  0x18   :  { %684 = vmatprep.subr.bf16.mxu0 %v1563_v23  ;;  %724 = vmatpush1.bf16.msra.mxu1 %v1562_v24  ;;  %v1674_v9 = vld [vmem:[%s2240_s2 + $0x304] ss:$8 sps:$4 sm:$0xff]   ;;  %v1672_v10 = vld [vmem:[%s2240_s2 + $0x300] ss:$8 sps:$4 sm:$0xff]   ;;  %v2013_v12 = vld [vmem:[%s2239_s1 + $0x10] sm:$0xff] }
  0x19   :  { %725 = vmatprep.subr.bf16.mxu1 %v1566_v25  ;;  %v1630_v11 = vld [vmem:[%s2240_s2 + $0x260] ss:$8 sps:$4 sm:$0xff]   ;;  %v1635_v13 = vld [vmem:[%s2240_s2 + $0x254] ss:$8 sps:$4 sm:$0xff]   ;;  %v1313_v14 = vcombine.high %v2013_v12, %v2013_v12  ;;  %v1633_v15 = vld [vmem:[%s2240_s2 + $0x250] ss:$8 sps:$4 sm:$0xff]  }
  0x1a   :  { %v1638_v17 = vld [vmem:[%s2240_s2 + $0x244] ss:$8 sps:$4 sm:$0xff]   ;;  %v1678_v18 = vld [vmem:[%s2239_s1 + $0x18] ss:$0 sps:$4 sm:$0xff]   ;;  %v1636_v19 = vld [vmem:[%s2240_s2 + $0x240] ss:$8 sps:$4 sm:$0xff]  }
  0x1b   :  { %685 = vmatpush1.bf16.msra.mxu0 %v1565_v26  ;;  %v1641_v20 = vld [vmem:[%s2240_s2 + $0x234] ss:$8 sps:$4 sm:$0xff]   ;;  %v1639_v21 = vld [vmem:[%s2240_s2 + $0x230] ss:$8 sps:$4 sm:$0xff]   ;;  %v1644_v22 = vld [vmem:[%s2240_s2 + $0x224] ss:$8 sps:$4 sm:$0xff]  }
  0x1c   :  { %686 = vmatprep.subr.bf16.mxu0 %v1569_v27  ;;  %726 = vmatpush1.bf16.msra.mxu1 %v1568_v28  ;;  %v1642_v23 = vld [vmem:[%s2240_s2 + $0x220] ss:$8 sps:$4 sm:$0xff]   ;;  %v1647_v24 = vld [vmem:[%s2240_s2 + $0x214] ss:$8 sps:$4 sm:$0xff]  }
  0x1d   :  { %727 = vmatprep.subr.bf16.mxu1 %v1572_v29 }
  0x1f   :  { %687 = vmatpush1.bf16.msra.mxu0 %v1571_v30 }
  0x20   :  { %688 = vmatprep.subr.bf16.mxu0 %v1575_v31  ;;  %728 = vmatpush1.bf16.msra.mxu1 %v1574_v32 }
  0x21   :  { %729 = vmatprep.subr.bf16.mxu1 %v1578_v33 }
  0x23   :  { %689 = vmatpush2.bf16.msra.mxu0 %v1577_v34 }
  0x24   :  { %690 = vmatprep.subr.bf16.mxu0 %v1581_v35  ;;  %730 = vmatpush2.bf16.msra.mxu1 %v1580_v36 }
  0x25   :  { %731 = vmatprep.subr.bf16.mxu1 %v1584_v37 }
  0x27   :  { %691 = vmatpush2.bf16.msra.mxu0 %v1583_v38 }
  0x28   :  { %692 = vmatprep.subr.bf16.mxu0 %v1587_v39  ;;  %732 = vmatpush2.bf16.msra.mxu1 %v1586_v40 }
  0x29   :  { %733 = vmatprep.subr.bf16.mxu1 %v1590_v41 }
  0x2b   :  { %693 = vmatpush2.bf16.msra.mxu0 %v1589_v42 }
  0x2c   :  { %694 = vmatprep.subr.bf16.mxu0 %v1593_v43  ;;  %734 = vmatpush2.bf16.msra.mxu1 %v1592_v44 }
  0x2d   :  { %735 = vmatprep.subr.bf16.mxu1 %v1596_v45 }
  0x2f   :  { %695 = vmatpush2.bf16.msra.mxu0 %v1595_v47 }
  0x30   :  { %696 = vmatprep.subr.bf16.mxu0 %v1599_v49  ;;  %736 = vmatpush2.bf16.msra.mxu1 %v1598_v51 }
  0x31   :  { %737 = vmatprep.subr.bf16.mxu1 %v1602_v53 }
  0x33   :  { %697 = vmatpush2.bf16.msra.mxu0 %v1601_v54 }
  0x34   :  { %698 = vmatprep.subr.bf16.mxu0 %v1605_v55  ;;  %738 = vmatpush2.bf16.msra.mxu1 %v1604_v56 }
  0x35   :  { %739 = vmatprep.subr.bf16.mxu1 %v1608_v57 }
  0x37   :  { %699 = vmatpush2.bf16.msra.mxu0 %v1607_v58 }
  0x38   :  { %700 = vmatprep.subr.bf16.mxu0 %v1611_v59  ;;  %740 = vmatpush2.bf16.msra.mxu1 %v1610_v60 }
  0x39   :  { %741 = vmatprep.subr.bf16.mxu1 %v1614_v61 }
  0x3b   :  { %701 = vmatpush2.bf16.msra.mxu0 %v1613_v62 }
  0x3c   :  { %702 = vmatprep.subr.bf16.mxu0 %v1617_v63  ;;  %742 = vmatpush2.bf16.msra.mxu1 %v1616_v0 }
  0x3d   :  { %743 = vmatprep.subr.bf16.mxu1 %v1620_v1 }
  0x3f   :  { %703 = vmatpush2.bf16.msra.mxu0 %v1619_v2 }
  0x40   :  { %754 = vmatprep.subr.bf16.mxu0 %v1627_v3  ;;  %744 = vmatpush2.bf16.msra.mxu1 %v1624_v4 }
  0x41   :  { %809 = vmatprep.subr.bf16.mxu1 %v1674_v9 }
  0x42   :  { %705 = vmatmul.mubr.bf16.vlgmr.msra.gmra.mxu0 %v1308_v5 }
  0x43   :  { %755 = vmatpush1.bf16.msra.mxu0 %v1625_v6  ;;  %746 = vmatmul.mubr.bf16.vlgmr.msra.gmra.mxu1 %v1310_v7 }
  0x44   :  { %756 = vmatprep.subr.bf16.mxu0 %v1632_v8  ;;  %810 = vmatpush1.bf16.msra.mxu1 %v1672_v10 }
  0x45   :  { %827 = vmatprep.mubr.bf16.mxu1 %v1735_v16  ;;  %786 = vmatprep.mubr.bf16.mxu0 %v1313_v14 }
  0x47   :  { %757 = vmatpush1.bf16.msra.mxu0 %v1630_v11 }
  0x48   :  { %758 = vmatprep.subr.bf16.mxu0 %v1635_v13 }
  0x4b   :  { %759 = vmatpush1.bf16.msra.mxu0 %v1633_v15  ;;  %1413 = vmatmul.mubr.msk.bf16.vlgmr.msra.gmra.mxu1 %vm668_vm0, %v1678_v18 }
  0x4c   :  { %760 = vmatprep.subr.bf16.mxu0 %v1638_v17 }
  0x4f   :  { %761 = vmatpush1.bf16.msra.mxu0 %v1636_v19 }
  0x50   :  { %762 = vmatprep.subr.bf16.mxu0 %v1641_v20 }
  0x53   :  { %763 = vmatpush1.bf16.msra.mxu0 %v1639_v21 }
  0x54   :  { %764 = vmatprep.subr.bf16.mxu0 %v1644_v22 }
  0x55   :  { %16 = vsyncpa [#allocation4], 0  ;;  %v1645_v25 = vld [vmem:[%s2240_s2 + $0x210] ss:$8 sps:$4 sm:$0xff]   ;;  %v1650_v26 = vld [vmem:[%s2240_s2 + $0x204] ss:$8 sps:$4 sm:$0xff]   ;;  %v1312_v44 = vcombine.low %v2013_v12, %v2013_v12  ;;  %v144_v10 = vlaneseq }
  0x56   :  { %v1648_v27 = vld [vmem:[%s2240_s2 + $0x200] ss:$8 sps:$4 sm:$0xff]   ;;  %v1653_v28 = vld [vmem:[%s2240_s2 + $0x2f4] ss:$8 sps:$4 sm:$0xff]   ;;  %v1651_v29 = vld [vmem:[%s2240_s2 + $0x2f0] ss:$8 sps:$4 sm:$0xff]  }
  0x57   :  { %765 = vmatpush1.bf16.msra.mxu0 %v1642_v23  ;;  %v1656_v30 = vld [vmem:[%s2240_s2 + $0x2e4] ss:$8 sps:$4 sm:$0xff]   ;;  %v1654_v31 = vld [vmem:[%s2240_s2 + $0x2e0] ss:$8 sps:$4 sm:$0xff]   ;;  %v1659_v32 = vld [vmem:[%s2240_s2 + $0x2d4] ss:$8 sps:$4 sm:$0xff]  }
  0x58   :  { %766 = vmatprep.subr.bf16.mxu0 %v1647_v24  ;;  %v1657_v33 = vld [vmem:[%s2240_s2 + $0x2d0] ss:$8 sps:$4 sm:$0xff]   ;;  %v1662_v34 = vld [vmem:[%s2240_s2 + $0x2c4] ss:$8 sps:$4 sm:$0xff]   ;;  %v1660_v35 = vld [vmem:[%s2240_s2 + $0x2c0] ss:$8 sps:$4 sm:$0xff]  }
  0x59   :  { %v1665_v36 = vld [vmem:[%s2240_s2 + $0x2b4] ss:$8 sps:$4 sm:$0xff]   ;;  %v1663_v37 = vld [vmem:[%s2240_s2 + $0x2b0] ss:$8 sps:$4 sm:$0xff]   ;;  %v1668_v38 = vld [vmem:[%s2240_s2 + $0x2a4] ss:$8 sps:$4 sm:$0xff]  }
  0x5a   :  { %v1666_v39 = vld [vmem:[%s2240_s2 + $0x2a0] ss:$8 sps:$4 sm:$0xff]   ;;  %v1671_v40 = vld [vmem:[%s2240_s2 + $0x294] ss:$8 sps:$4 sm:$0xff]   ;;  %v1669_v41 = vld [vmem:[%s2240_s2 + $0x290] ss:$8 sps:$4 sm:$0xff]  }
  0x5b   :  { %767 = vmatpush1.bf16.msra.mxu0 %v1645_v25  ;;  %v1677_v42 = vld [vmem:[%s2240_s2 + $0x284] ss:$8 sps:$4 sm:$0xff]   ;;  %v1675_v43 = vld [vmem:[%s2240_s2 + $0x280] ss:$8 sps:$4 sm:$0xff]   ;;  %v1681_v45 = vld [vmem:[%s2242_s4 + $0x78] sm:$0xff]   ;;  %v1736_v61 = vmov 0.0  }
  0x5c   :  { %768 = vmatprep.subr.bf16.mxu0 %v1650_v26  ;;  %v1682_v46 = vld [vmem:[%s2242_s4 + $0x38] sm:$0xff]   ;;  %v1683_v47 = vld [vmem:[%s2242_s4 + $0x70] sm:$0xff]   ;;  %1455 = vmatprep.subr.bf16.mxu1 %v1681_v45  ;;  %v1685_v49 = vld [vmem:[%s2242_s4 + $0x68] sm:$0xff]   ;;  %v2157_v11 = vand.u32 127, %v144_v10  ;;  %v145_v12 = vshrl.u32 %v144_v10, 7  ;;  %vm1737_vm5 = vmmov 0  }
  0x5d   :  { %1456 = vmatpush3.bf16.msra.mxu1 %v1682_v46  ;;  %v1684_v48 = vld [vmem:[%s2242_s4 + $0x30] sm:$0xff]   ;;  %v1686_v50 = vld [vmem:[%s2242_s4 + $0x28] sm:$0xff]   ;;  %v1687_v51 = vld [vmem:[%s2242_s4 + $0x60] sm:$0xff]   ;;  %s2162_s24 = smul.u32 2654435769, %s2238_s0  ;;  %vm1238_vm9 = vcmask 523264  }
  0x5e   :  { %1457 = vmatprep.subr.bf16.mxu1 %v1683_v47  ;;  %v1688_v52 = vld [vmem:[%s2242_s4 + $0x20] sm:$0xff]   ;;  %v1689_v53 = vld [vmem:[%s2242_s4 + $0x58] sm:$0xff]   ;;  %v1691_v55 = vld [vmem:[%s2242_s4 + $0x50] sm:$0xff]   ;;  %v845_v13 = vmul.u32 256, %v145_v12  ;;  %v842_v14 = vadd.s32 128, %v2157_v11  ;;  %vm1282_vm10 = vcmp.lt.s32.totalorder %v2157_v11, 10 }
  0x5f   :  { %769 = vmatpush1.bf16.msra.mxu0 %v1648_v27  ;;  %v1690_v54 = vld [vmem:[%s2242_s4 + $0x18] sm:$0xff]   ;;  %v1692_v56 = vld [vmem:[%s2242_s4 + $0x10] sm:$0xff]   ;;  %v1693_v57 = vld [vmem:[%s2242_s4 + $0x48] sm:$0xff]   ;;  %s849_s25 = sadd.s32 2654435769, %s2162_s24 }
  0x60   :  { %770 = vmatprep.subr.bf16.mxu0 %v1653_v28  ;;  %v1694_v58 = vld [vmem:[%s2242_s4 + $0x8] sm:$0xff]   ;;  %v1695_v59 = vld [vmem:[%s2242_s4 + $0x40] sm:$0xff]   ;;  %v847_v15 = vadd.s32 %v845_v13, %v842_v14  ;;  %v2167_v16 = vadd.s32 %v845_v13, %v2157_v11  ;;  %v850_v17 = vstv %s849_s25  ;;  %v146_v28 = vsub.s32 0, %v145_v12  ;;  %s1183_s27 = sadd.s32 3668340011, %s2162_s24 }
  0x61   :  { %1458 = vmatpush3.bf16.msra.mxu1 %v1684_v48  ;;  %v1696_v60 = vld [vmem:[%s2242_s4] sm:$0xff]  }
  0x62   :  { %1459 = vmatprep.subr.bf16.mxu1 %v1685_v49  ;;  %v852_v18 = vxor.u32 %v850_v17, %v847_v15  ;;  %v851_v19 = vxor.u32 %v850_v17, %v2167_v16 }
  0x63   :  { %771 = vmatpush2.bf16.msra.mxu0 %v1651_v29 }
  0x64   :  { %772 = vmatprep.subr.bf16.mxu0 %v1656_v30  ;;  %v854_v20 = vshrl.u32 %v852_v18, 16  ;;  %v853_v21 = vshrl.u32 %v851_v19, 16  ;;  %v142_v30 = vld [vmem:[%s2241_s3] sm:$0x3] }
  0x65   :  { %1460 = vmatpush3.bf16.msra.mxu1 %v1686_v50 }
  0x66   :  { %1461 = vmatprep.subr.bf16.mxu1 %v1687_v51  ;;  %v856_v22 = vxor.u32 %v854_v20, %v852_v18  ;;  %v855_v23 = vxor.u32 %v853_v21, %v851_v19  ;;  %v1414_v21 = vld [vmem:[%s2243_s5] ss:$0 sm:$0xff] }
  0x67   :  { %773 = vmatpush2.bf16.msra.mxu0 %v1654_v31 }
  0x68   :  { %774 = vmatprep.subr.bf16.mxu0 %v1659_v32  ;;  %v858_v24 = vmul.u32 2246822507, %v856_v22  ;;  %v857_v25 = vmul.u32 2246822507, %v855_v23  ;;  %v150_v32 = vsub.s32 1, %v145_v12 }
  0x69   :  { %1462 = vmatpush3.bf16.msra.mxu1 %v1688_v52 }
  0x6a   :  { %1463 = vmatprep.subr.bf16.mxu1 %v1689_v53  ;;  %v860_v26 = vshrl.u32 %v858_v24, 13  ;;  %v859_v27 = vshrl.u32 %v857_v25, 13 }
  0x6b   :  { %775 = vmatpush2.bf16.msra.mxu0 %v1657_v33  ;;  %v147_v33 = vrot.slane %v142_v30, %v146_v28 }
  0x6c   :  { %776 = vmatprep.subr.bf16.mxu0 %v1662_v34  ;;  %v862_v29 = vxor.u32 %v860_v26, %v858_v24  ;;  %v861_v31 = vxor.u32 %v859_v27, %v857_v25 }
  0x6d   :  { %1464 = vmatpush3.bf16.msra.mxu1 %v1690_v54 }
  0x6e   :  { %1465 = vmatprep.subr.bf16.mxu1 %v1691_v55  ;;  %v864_v34 = vmul.u32 3266489909, %v862_v29 }
  0x6f   :  { %777 = vmatpush2.bf16.msra.mxu0 %v1660_v35  ;;  %v863_v35 = vmul.u32 3266489909, %v861_v31  ;;  %v1707_v31 = vld [vmem:[%s2246_s8 + $0x8] sm:$0xff]  }
  0x70   :  { %778 = vmatprep.subr.bf16.mxu0 %v1665_v36  ;;  %v151_v36 = vrot.slane %v142_v30, %v150_v32  ;;  %v1708_v32 = vld [vmem:[%s2246_s8] sm:$0xff]  }
  0x71   :  { %1466 = vmatpush3.bf16.msra.mxu1 %v1692_v56 }
  0x72   :  { %1467 = vmatprep.subr.bf16.mxu1 %v1693_v57 }
  0x73   :  { %779 = vmatpush2.bf16.msra.mxu0 %v1663_v37 }
  0x74   :  { %780 = vmatprep.subr.bf16.mxu0 %v1668_v38  ;;  %v866_v38 = vshrl.u32 %v864_v34, 16 }
  0x75   :  { %1468 = vmatpush3.bf16.msra.mxu1 %v1694_v58 }
  0x76   :  { %1469 = vmatprep.subr.bf16.mxu1 %v1695_v59 }
  0x77   :  { %781 = vmatpush2.bf16.msra.mxu0 %v1666_v39  ;;  %v865_v39 = vshrl.u32 %v863_v35, 16 }
  0x78   :  { %782 = vmatprep.subr.bf16.mxu0 %v1671_v40 }
  0x79   :  { %1470 = vmatpush3.bf16.msra.mxu1 %v1696_v60  ;;  %v1697_v60 = vld [vmem:[%s2244_s6 + $0x38] sm:$0xff]  }
  0x7a   :  { %1491 = vmatprep.subr.bf16.mxu1 %v1736_v61 }
  0x7b   :  { %783 = vmatpush2.bf16.msra.mxu0 %v1669_v41 }
  0x7c   :  { %784 = vmatprep.subr.bf16.mxu0 %v1677_v42  ;;  %v868_v42 = vxor.u32 %v866_v38, %v864_v34 }
  0x7e   :  { %v870_v50 = vshrl.u32 %v868_v42, 9 }
  0x7f   :  { %785 = vmatpush2.bf16.msra.mxu0 %v1675_v43 }
  0x80   :  { %1511 = vmatprep.subr.bf16.mxu0 %v1736_v61  ;;  %vm872_vm1 = vcmp.ge.s32.totalorder %v870_v50, 1677721 }
  0x81   :  { %vm1431_vm3 = vmpackc.low %vm872_vm1, %vm872_vm1 }
  0x82   :  { %787 = vmatmul.mubr.bf16.vlgmr.msra.gmra.mxu0 %v1312_v44  ;;  %v867_v44 = vxor.u32 %v865_v39, %v863_v35 }
  0x83   :  { %1519 = vmatprep.mubr.msk.bf16.mxu0 %vm1737_vm5, %v1736_v61 }
  0x84   :  { %v869_v52 = vshrl.u32 %v867_v44, 9 }
  0x86   :  { %vm871_vm2 = vcmp.ge.s32.totalorder %v869_v52, 1677721  ;;  %v1449_v52 = vld [vmem:[%s2247_s9] ss:$0 sm:$0xff] }
  0x87   :  { %vm1434_vm4 = vmpackc.low %vm871_vm2, %vm871_vm2 }
 0x102   :  { %v706_v62 = vpop.f32.mrf.mxu0 }
 0x103   :  { %v747_v0 = vpop.f32.mrf.mxu1  ;;  %v707_v37 = vadd.f32 %v706_v62, %v147_v33  ;;  %v1184_v33 = vstv %s1183_s27 }
 0x104   :  { %v708_v63 = vpop.f32.mrf.mxu0  ;;  %v1185_v34 = vxor.u32 %v1184_v33, %v2167_v16 }
 0x105   :  { %v749_v2 = vpop.f32.mrf.mxu1  ;;  %v709_v40 = vadd.f32 %v708_v63, %v151_v36  ;;  %v748_v41 = vadd.f32 %v747_v0, %v707_v37  ;;  %v1698_v63 = vld [vmem:[%s2244_s6 + $0x30] sm:$0xff]   ;;  %v1699_v0 = vld [vmem:[%s2244_s6 + $0x28] sm:$0xff]  }
 0x106   :  { %v710_v1 = vpop.f32.mrf.mxu0  ;;  %v1186_v35 = vshrl.u32 %v1185_v34, 16 }
 0x107   :  { %v751_v4 = vpop.f32.mrf.mxu1  ;;  %v750_v45 = vadd.f32 %v749_v2, %v709_v40  ;;  %v1700_v1 = vld [vmem:[%s2244_s6 + $0x20] sm:$0xff]   ;;  %v1701_v2 = vld [vmem:[%s2244_s6 + $0x18] sm:$0xff]  }
 0x108   :  { %v711_v3 = vpop.f32.mrf.mxu0  ;;  %v1703_v4 = vld [vmem:[%s2244_s6 + $0x8] sm:$0xff]   ;;  %v1187_v36 = vxor.u32 %v1186_v35, %v1185_v34 }
 0x109   :  { %v752_v5 = vpop.f32.mrf.mxu1  ;;  %v1702_v3 = vld [vmem:[%s2244_s6 + $0x10] sm:$0xff]  }
 0x10a   :  { %v1704_v5 = vld [vmem:[%s2244_s6] sm:$0xff]   ;;  %s1055_s6 = sadd.s32 1013904242, %s2162_s24  ;;  %v1188_v37 = vmul.u32 2246822507, %v1187_v36 }
 0x10b   :  { %v829_v6 = vpop.f32.mrf.mxu1 }
 0x10c   :  { %v1189_v38 = vshrl.u32 %v1188_v37, 13 }
 0x10d   :  { %v831_v7 = vpop.f32.mrf.mxu1 }
 0x10e   :  { %v1190_v39 = vxor.u32 %v1189_v38, %v1188_v37 }
 0x10f   :  { %v833_v8 = vpop.f32.mrf.mxu1 }
 0x110   :  { %v1056_v8 = vstv %s1055_s6  ;;  %v1191_v40 = vmul.u32 3266489909, %v1190_v39 }
 0x111   :  { %v834_v9 = vpop.f32.mrf.mxu1 }
 0x112   :  { %v1057_v9 = vxor.u32 %v1056_v8, %v2167_v16 }
 0x114   :  { %v1058_v10 = vshrl.u32 %v1057_v9, 16 }
 0x116   :  { %v1059_v12 = vxor.u32 %v1058_v10, %v1057_v9 }
 0x118   :  { %v1060_v13 = vmul.u32 2246822507, %v1059_v12 }
 0x11a   :  { %v1061_v14 = vshrl.u32 %v1060_v13, 13 }
 0x11c   :  { %v1062_v15 = vxor.u32 %v1061_v14, %v1060_v13 }
 0x11e   :  { %v1063_v17 = vmul.u32 3266489909, %v1062_v15 }
 0x120   :  { %v1064_v18 = vshrl.u32 %v1063_v17, 16 }
 0x122   :  { %v1065_v19 = vxor.u32 %v1064_v18, %v1063_v17 }
 0x124   :  { %v1066_v24 = vshrl.u32 %v1065_v19, 9 }
 0x126   :  { %vm1067_vm6 = vcmp.ge.s32.totalorder %v1066_v24, 1677721 }
 0x127   :  { %vm1446_vm7 = vmpackc.low %vm1067_vm6, %vm1067_vm6 }
 0x142   :  { %v788_v43 = vpop.f32.mrf.mxu0 }
 0x143   :  { %v789_v46 = vadd.f32 %v788_v43, %v748_v41  ;;  %v1192_v41 = vshrl.u32 %v1191_v40, 16 }
 0x144   :  { %v790_v47 = vpop.f32.mrf.mxu0 }
 0x145   :  { %v830_v48 = vadd.f32 %v829_v6, %v789_v46  ;;  %v791_v49 = vadd.f32 %v790_v47, %v750_v45  ;;  %v1705_v6 = vld [vmem:[%s2246_s8 + $0x18] sm:$0xff]   ;;  %v1193_v42 = vxor.u32 %v1192_v41, %v1191_v40 }
 0x146   :  { %v792_v51 = vpop.f32.mrf.mxu0  ;;  %1512 = vmatpush3.bf16.msra.mxu0 %v1705_v6 }
 0x147   :  { %v836_v53 = vmax.f32 %v830_v48, 0.0  ;;  %v832_v54 = vadd.f32 %v831_v7, %v791_v49  ;;  %v1706_v7 = vld [vmem:[%s2246_s8 + $0x10] sm:$0xff]   ;;  %1513 = vmatprep.subr.bf16.mxu0 %v1736_v61  ;;  %v1194_v44 = vshrl.u32 %v1193_v42, 9 }
 0x148   :  { %v793_v55 = vpop.f32.mrf.mxu0 }
 0x149   :  { %v837_v56 = vmax.f32 %v832_v54, 0.0  ;;  %v873_v57 = vmul.f32 1.25, %v836_v53  ;;  %vm1195_vm8 = vcmp.ge.s32.totalorder %v1194_v44, 1677721 }
 0x14a   :  { %1514 = vmatpush3.bf16.msra.mxu0 %v1706_v7 }
 0x14b   :  { %v874_v58 = vmul.f32 1.25, %v837_v56  ;;  %v1435_v62 = vpack.c.bf16 %v873_v57, %v873_v57  ;;  %1515 = vmatprep.subr.bf16.mxu0 %v1736_v61 }
 0x14d   :  { %v1432_v59 = vpack.c.bf16 %v874_v58, %v874_v58 }
 0x14e   :  { %1516 = vmatpush3.bf16.msra.mxu0 %v1707_v31 }
 0x14f   :  { %1433 = vmatprep.mubr.msk.bf16.mxu1 %vm1431_vm3, %v1432_v59  ;;  %1517 = vmatprep.subr.bf16.mxu0 %v1736_v61 }
 0x150   :  { %1436 = vmatmul.mubr.msk.bf16.vlgmr.msra.gmra.mxu1 %vm1434_vm4, %v1435_v62 }
 0x151   :  { %1492 = vmatpush3.bf16.msra.mxu1 %v1697_v60  ;;  %1507 = vmatprep.mubr.msk.bf16.mxu1 %vm1737_vm5, %v1736_v61 }
 0x152   :  { %1493 = vmatprep.subr.bf16.mxu1 %v1736_v61  ;;  %1518 = vmatpush3.bf16.msra.mxu0 %v1708_v32 }
 0x155   :  { %1494 = vmatpush3.bf16.msra.mxu1 %v1698_v63 }
 0x156   :  { %1495 = vmatprep.subr.bf16.mxu1 %v1736_v61 }
 0x159   :  { %1496 = vmatpush3.bf16.msra.mxu1 %v1699_v0 }
 0x15a   :  { %1497 = vmatprep.subr.bf16.mxu1 %v1736_v61 }
 0x15d   :  { %1498 = vmatpush3.bf16.msra.mxu1 %v1700_v1 }
 0x15e   :  { %1499 = vmatprep.subr.bf16.mxu1 %v1736_v61 }
 0x161   :  { %1500 = vmatpush3.bf16.msra.mxu1 %v1701_v2 }
 0x162   :  { %1501 = vmatprep.subr.bf16.mxu1 %v1736_v61 }
 0x165   :  { %1502 = vmatpush3.bf16.msra.mxu1 %v1702_v3 }
 0x166   :  { %1503 = vmatprep.subr.bf16.mxu1 %v1736_v61 }
 0x169   :  { %1504 = vmatpush3.bf16.msra.mxu1 %v1703_v4 }
 0x16a   :  { %1505 = vmatprep.subr.bf16.mxu1 %v1736_v61  ;;  %v1437_v61 = vld [vmem:[%s2245_s7] ss:$0 sm:$0xff]  ;;  %s1738_s7 = smov [#allocation3]  }
 0x16b   :  { %s1300_s30 = sshll.u32 %s1738_s7, 4  ;;  %s1301_s30 = int_to_ptr.vmem [resolvable:$true] %s1300_s30 }
 0x16c   :  { %s1713_s9 = scalar_lea.vmem %s1301_s30, 128  ;;  %p1718_p1 = scmp.lt.s32.totalorder %s1301_s30, %s1301_s30 }
 0x16d   :  { %1506 = vmatpush3.bf16.msra.mxu1 %v1704_v5  ;;  %p1714_p0 = scmp.ne.s32.totalorder %s1301_s30, %s1713_s9  ;;  %p1719_p2 = scmp.lt.s32.totalorder %s1713_s9, %s1713_s9 }
 0x16f   :  { %p1720_p3 = por %p1719_p2, %p1718_p1 }
 0x171   :  { %p1721_p4 = pnand %p1720_p3, %p1714_p0 }
 0x210   :  { %v1471_v20 = vpop.f32.mrf.mxu1 }
 0x212   :  { %v1472_v22 = vpop.f32.mrf.mxu1 }
 0x213   :  { %v1473_v23 = vadd.f32 %v1472_v22, %v1471_v20 }
 0x214   :  { %v1474_v25 = vpop.f32.mrf.mxu1 }
 0x215   :  { %v1049_v26 = vadd.f32 %v1473_v23, %v1414_v21 }
 0x216   :  { %v1475_v27 = vpop.f32.mrf.mxu1 }
 0x217   :  { %v1054_v28 = vmax.f32 %v1049_v26, 0.0 }
 0x219   :  { %v1068_v29 = vmul.f32 1.25, %v1054_v28 }
 0x21b   :  { %v1447_v30 = vpack.c.bf16 %v1068_v29, %v1068_v29 }
 0x21d   :  { %1508 = vmatmul.mubr.msk.bf16.vlgmr.msra.gmra.mxu1 %vm1446_vm7, %v1447_v30 }
 0x2dd   :  { %v1176_v43 = vpop.f32.mrf.mxu1 }
 0x2de   :  { %v1177_v45 = vadd.f32 %v1437_v61, %v1176_v43 }
 0x2df   :  { %v1509_v46 = vpop.f32.mrf.mxu1 }
 0x2e0   :  { %v1182_v47 = vmax.f32 %v1177_v45, 0.0 }
 0x2e1   :  { %v1179_v48 = vpop.f32.mrf.mxu1 }
 0x2e2   :  { %v1196_v16 = vmul.f32 1.25, %v1182_v47 }
 0x2e3   :  { %v1510_v49 = vpop.f32.mrf.mxu1 }
 0x2e4   :  { %v1197_v50 = vsel %vm1195_vm8, %v1196_v16, 0.0 }
 0x2e5   :  { %v1198_v51 = vpack.c.bf16 %v1197_v50, %v1197_v50 }
 0x2e7   :  { %1520 = vmatmul.mubr.msk.bf16.vlgmr.msra.gmra.mxu0 %vm1238_vm9, %v1198_v51 }
 0x3a7   :  { %v1276_v53 = vpop.f32.mrf.mxu0 }
 0x3a8   :  { %v1277_v54 = vadd.f32 %v1449_v52, %v1276_v53 }
 0x3a9   :  { %v1521_v55 = vpop.f32.mrf.mxu0 }
 0x3aa   :  { %v1283_v56 = vsel %vm1282_vm10, %v1277_v54, -1e+30 }
 0x3ab   :  { %1284 = vmax.xlane.f32.xlu0 %v1283_v56  ;;  %v1279_v57 = vpop.f32.mrf.mxu0 }
 0x3ad   :  { %v1522_v58 = vpop.f32.mrf.mxu0 }
 0x434   :  { %v1285_v59 = vpop.xlane.xlu0 %1284 }
 0x435   :  { %v1286_v60 = vsub.f32 %v1283_v56, %v1285_v59 }
 0x437   :  { %v1287_v62 = vmul.f32 1.442695, %v1286_v60 }
 0x439   :  { %1709 = vpow2.f32 %v1287_v62 }
 0x446   :  { %v1710_v63 = vpop.eup %1709 }
 0x447   :  { %1289 = vadd.xlane.f32.xlu0 %v1710_v63 }
 0x4d0   :  { %v1290_v0 = vpop.xlane.xlu0 %1289 }
 0x4d1   :  { %1711 = vrcp.f32 %v1290_v0 }
 0x4de   :  { %v1712_v1 = vpop.eup %1711 }
 0x4df   :  { %v1292_v2 = vmul.f32 %v1712_v1, %v1710_v63 }
 0x4e1   :  { %1293 = vst [vmem:[#allocation3] sm:$0xff] %v1292_v2 }
 0x4e2   :  { %1724 = shalt.err (!%p1721_p4)
}
 0x4e3   :  { %1303 = dma.vmem_to_hbm [thread:$0]  %s1301_s30, 128, %s2248_s10, [#allocation4]  }
 0x4e4   :  { %1733 = dma.done.wait [#allocation4], 128  }
 0x4e5   :  { %1734 = vsyncadd [#allocation4], 4294967168 }
 0x4e6   :  { %1307 = vsyncpa [#allocation4], 1 }

</bundles_post_ra>
